<compile_context>
chip_gen: v7x
topology: tpu7x:2x2x1
jax: 0.10.0
libtpu: 0.0.40
codegen_flags: <defaults>
</compile_context>

<pallas_src>
import functools

import jax
import jax.numpy as jnp
from jax.experimental import pallas as pl
from jax.experimental.pallas import tpu as pltpu


def _cdiv(a, b):
    return (a + b - 1) // b


def _round_up(a, b):
    return ((a + b - 1) // b) * b


def _nearest_idx(out_size, in_size):
    # PyTorch F.interpolate(mode='nearest') legacy rule:
    #   src = min(floor(dst * (in/out)), in - 1)
    return jnp.minimum(
        jnp.floor(jnp.arange(out_size, dtype=jnp.float32) * (in_size / out_size)),
        in_size - 1,
    ).astype(jnp.int32)


def _snl_kernel(pred_ref, gt_ref, sum_ref, cnt_ref, *, h, th, mask_rows):
    # pred_ref / gt_ref: (1, 3, TH, W) blocks in native spatial layout.
    # sum_ref / cnt_ref: (1, 1, 1, W) per-(sample, split) lane-partial
    # accumulators, resident across the chunk (reduction) grid axis.
    @pl.when(pl.program_id(2) == 0)
    def _():
        sum_ref[...] = jnp.zeros_like(sum_ref)
        cnt_ref[...] = jnp.zeros_like(cnt_ref)

    # Cast on load: pred/gt may arrive as bf16/f16; all math is f32.
    p0 = pred_ref[0, 0].astype(jnp.float32)
    p1 = pred_ref[0, 1].astype(jnp.float32)
    p2 = pred_ref[0, 2].astype(jnp.float32)
    g0 = gt_ref[0, 0].astype(jnp.float32)
    g1 = gt_ref[0, 1].astype(jnp.float32)
    g2 = gt_ref[0, 2].astype(jnp.float32)

    # labels = gt.max(dim=channel) != 0
    mask = jnp.maximum(g0, jnp.maximum(g1, g2)) != 0.0

    if mask_rows:
        # Ragged boundary block: rows past H contain unspecified data -> mask.
        chunk = pl.program_id(1) * pl.num_programs(2) + pl.program_id(2)
        row = jax.lax.broadcasted_iota(jnp.int32, g0.shape, 0) + chunk * th
        mask = jnp.logical_and(mask, row < h)

    # Exact refactoring of Normalize(+1e-12) followed by CosineSimilarity(1e-8):
    #   cos = (p.g)*inv / max(|p||g|*inv, 1e-8),  inv = 1/((|p|+e12)(|g|+e12))
    # Approx reciprocal is safe: inv appears in both numerator and denominator
    # of the unclamped branch, so its error cancels; the clamped branch only
    # triggers for (near-)zero vectors where cos ~ 0 anyway.
    ssq_p = p0 * p0 + p1 * p1 + p2 * p2
    ssq_g = g0 * g0 + g1 * g1 + g2 * g2
    dot = p0 * g0 + p1 * g1 + p2 * g2
    norm_p = jnp.sqrt(ssq_p)
    norm_g = jnp.sqrt(ssq_g)
    inv = pl.reciprocal((norm_p + 1e-12) * (norm_g + 1e-12), approx=True)
    cos = (dot * inv) / jnp.maximum(norm_p * norm_g * inv, 1e-8)

    contrib = jnp.where(mask, 1.0 - cos, 0.0)
    valid = mask.astype(jnp.float32)

    # Reduce only the sublane (row) axis per step; the single tiny cross-lane
    # reduction happens once in the wrapper.
    sum_ref[0, 0] += jnp.sum(contrib, axis=0, keepdims=True)
    cnt_ref[0, 0] += jnp.sum(valid, axis=0, keepdims=True)


def surface_normal_loss(pred, gt, block_elems=512 * 1024):
    """pred: (N, 3, H, W) float; gt: (N, 3, Hg, Wg) float/int (low resolution ok)."""
    n, c, h, w = pred.shape
    assert c == 3, "surface normals have 3 channels"
    assert gt.shape[0] == n and gt.shape[1] == 3
    hg, wg = gt.shape[2], gt.shape[3]

    # --- gt path: fused nearest-neighbour upsample (single gather, no pad) ---
    # Keep narrow float sources narrow (halves the gt HBM stream); cast-to-f32
    # happens in-kernel and is exact, so the `!= 0` mask is unchanged.
    if gt.dtype in (jnp.bfloat16, jnp.float16):
        gt_src = gt
    else:
        gt_src = gt.astype(jnp.float32)          # matches torch gt.float()
    hi = _nearest_idx(h, hg)
    wi = _nearest_idx(w, wg)
    flat_idx = hi[:, None] * wg + wi[None, :]     # (h, w) indices into hg*wg
    gt_up = jnp.take(gt_src.reshape(n, 3, hg * wg), flat_idx, axis=2)  # (n,3,h,w)

    # --- row-chunk tiling ---
    # ~block_elems pixels per block (~6 MiB f32 with 3 channels); TH multiple
    # of 8; make the chunk count even so a 2-way parallel split keeps both v7x
    # TensorCores busy at small batch without duplicate work on 1-TC chips.
    th = min(_round_up(_cdiv(block_elems, w), 8), _round_up(h, 8))
    th = max(th, 8)
    nc = _cdiv(h, th)
    if nc % 2 == 1:
        th2 = _round_up(_cdiv(h, nc + 1), 8)
        if _cdiv(h, th2) == nc + 1:
            th, nc = th2, nc + 1
    nsplit = 2 if nc % 2 == 0 else 1
    nch = nc // nsplit
    mask_rows = (h % th) != 0

    kernel = functools.partial(_snl_kernel, h=h, th=th, mask_rows=mask_rows)

    in_map = lambda b, s, k: (b, 0, s * nch + k, 0)
    out_map = lambda b, s, k: (b, s, 0, 0)

    psum, pcnt = pl.pallas_call(
        kernel,
        out_shape=(
            jax.ShapeDtypeStruct((n, nsplit, 1, w), jnp.float32),
            jax.ShapeDtypeStruct((n, nsplit, 1, w), jnp.float32),
        ),
        grid_spec=pltpu.PrefetchScalarGridSpec(
            num_scalar_prefetch=0,
            grid=(n, nsplit, nch),                       # reduction axis last
            in_specs=[
                pl.BlockSpec((1, 3, th, w), in_map),     # pred, native layout
                pl.BlockSpec((1, 3, th, w), in_map),     # upsampled gt
            ],
            out_specs=[
                pl.BlockSpec((1, 1, 1, w), out_map),
                pl.BlockSpec((1, 1, 1, w), out_map),
            ],
        ),
        compiler_params=pltpu.CompilerParams(
            dimension_semantics=("parallel", "parallel", "arbitrary"),
            vmem_limit_bytes=48 * 1024 * 1024,
        ),
    )(pred, gt_up)

    # Masked mean (0/0 -> nan, same as torch .mean() over an empty selection).
    return jnp.sum(psum) / jnp.sum(pcnt)


def _reference(pred, gt):
    # Pure-JAX reference mirroring the PyTorch module (masked mean via where).
    n, c, h, w = pred.shape
    hg, wg = gt.shape[2], gt.shape[3]
    hi = _nearest_idx(h, hg)
    wi = _nearest_idx(w, wg)
    gt_i = gt.astype(jnp.float32)[:, :, hi, :][:, :, :, wi]
    p = jnp.transpose(pred.astype(jnp.float32), (0, 2, 3, 1)).reshape(-1, 3)
    g = jnp.transpose(gt_i, (0, 2, 3, 1)).reshape(-1, 3)
    labels = jnp.max(g, axis=1) != 0
    pn = p / (jnp.linalg.norm(p, axis=1, keepdims=True) + 1e-12)
    gn = g / (jnp.linalg.norm(g, axis=1, keepdims=True) + 1e-12)
    dot = jnp.sum(pn * gn, axis=1)
    denom = jnp.maximum(
        jnp.linalg.norm(pn, axis=1) * jnp.linalg.norm(gn, axis=1), 1e-8
    )
    cos = dot / denom
    return jnp.sum(jnp.where(labels, 1.0 - cos, 0.0)) / jnp.sum(labels)


if __name__ == "__main__":
    key = jax.random.PRNGKey(0)
    k1, k2 = jax.random.split(key)

    # pred: (N, 3, H, W); gt at half resolution, nearest-interpolated to (H, W).
    pred = jax.random.normal(k1, (2, 3, 16, 16), dtype=jnp.float32)
    gt = jax.random.normal(k2, (2, 3, 8, 8), dtype=jnp.float32)
    # Zero out some GT pixels (all channels) so the `labels` mask is exercised.
    gt = gt.at[:, :, :2, :].set(0.0)

    loss = jax.block_until_ready(surface_normal_loss(pred, gt))
    ref = jax.block_until_ready(_reference(pred, gt))
    assert jnp.allclose(loss, ref, atol=1e-5, rtol=1e-5), (loss, ref)

    print("KERNEL_OK")
</pallas_src>

<mosaic_0001>
module attributes {stable_mosaic.version = 11 : i64} {
  func.func @_snl_kernel(%arg0: i32, %arg1: i32, %arg2: i32, %arg3: memref<1x3x8x16xf32, #tpu.memory_space<vmem>>, %arg4: memref<1x3x8x16xf32, #tpu.memory_space<vmem>>, %arg5: memref<1x1x1x16xf32, #tpu.memory_space<vmem>>, %arg6: memref<1x1x1x16xf32, #tpu.memory_space<vmem>>) attributes {dimension_semantics = [#tpu.dimension_semantics<parallel>, #tpu.dimension_semantics<parallel>, #tpu.dimension_semantics<arbitrary>], iteration_bounds = array<i64: 2, 2, 1>, scalar_prefetch = 0 : i64, scratch_operands = 0 : i64, tpu.core_type = #tpu.core_type<tc>, window_params = [{transform_indices = @transform_0, window_bounds = array<i64: 1, 3, 8, 16>}, {transform_indices = @transform_1, window_bounds = array<i64: 1, 3, 8, 16>}, {transform_indices = @transform_2, window_bounds = array<i64: 1, 1, 1, 16>}, {transform_indices = @transform_3, window_bounds = array<i64: 1, 1, 1, 16>}]} {
    %c0_i32 = arith.constant 0 : i32
    %0 = arith.cmpi eq, %arg2, %c0_i32 : i32
    %1 = arith.extui %0 : i1 to i32
    %c0_i32_0 = arith.constant 0 : i32
    %2 = arith.cmpi ne, %1, %c0_i32_0 : i32
    scf.if %2 {
      %cst_45 = arith.constant 0.000000e+00 : f32
      %70 = vector.broadcast %cst_45 : f32 to vector<1x1x1x16xf32>
      %c0_46 = arith.constant 0 : index
      %c0_47 = arith.constant 0 : index
      %c0_48 = arith.constant 0 : index
      %c0_49 = arith.constant 0 : index
      %71 = vector.load %arg5[%c0_46, %c0_47, %c0_48, %c0_49] : memref<1x1x1x16xf32, #tpu.memory_space<vmem>>, vector<1x1x1x16xf32>
      tpu.vector_store %arg5[%c0_46, %c0_47, %c0_48, %c0_49], %70 {strides = array<i32>} : memref<1x1x1x16xf32, #tpu.memory_space<vmem>>, vector<1x1x1x16xf32>,
      %cst_50 = arith.constant 0.000000e+00 : f32
      %72 = vector.broadcast %cst_50 : f32 to vector<1x1x1x16xf32>
      %c0_51 = arith.constant 0 : index
      %c0_52 = arith.constant 0 : index
      %c0_53 = arith.constant 0 : index
      %c0_54 = arith.constant 0 : index
      %73 = vector.load %arg6[%c0_51, %c0_52, %c0_53, %c0_54] : memref<1x1x1x16xf32, #tpu.memory_space<vmem>>, vector<1x1x1x16xf32>
      tpu.vector_store %arg6[%c0_51, %c0_52, %c0_53, %c0_54], %72 {strides = array<i32>} : memref<1x1x1x16xf32, #tpu.memory_space<vmem>>, vector<1x1x1x16xf32>,
    } else {
    }
    %c0 = arith.constant 0 : index
    %c0_1 = arith.constant 0 : index
    %c0_2 = arith.constant 0 : index
    %c0_3 = arith.constant 0 : index
    %3 = vector.load %arg3[%c0, %c0_1, %c0_2, %c0_3] : memref<1x3x8x16xf32, #tpu.memory_space<vmem>>, vector<1x1x8x16xf32>
    %4 = vector.shape_cast %3 : vector<1x1x8x16xf32> to vector<8x16xf32>
    %c0_4 = arith.constant 0 : index
    %c1 = arith.constant 1 : index
    %c0_5 = arith.constant 0 : index
    %c0_6 = arith.constant 0 : index
    %5 = vector.load %arg3[%c0_4, %c1, %c0_5, %c0_6] : memref<1x3x8x16xf32, #tpu.memory_space<vmem>>, vector<1x1x8x16xf32>
    %6 = vector.shape_cast %5 : vector<1x1x8x16xf32> to vector<8x16xf32>
    %c0_7 = arith.constant 0 : index
    %c2 = arith.constant 2 : index
    %c0_8 = arith.constant 0 : index
    %c0_9 = arith.constant 0 : index
    %7 = vector.load %arg3[%c0_7, %c2, %c0_8, %c0_9] : memref<1x3x8x16xf32, #tpu.memory_space<vmem>>, vector<1x1x8x16xf32>
    %8 = vector.shape_cast %7 : vector<1x1x8x16xf32> to vector<8x16xf32>
    %c0_10 = arith.constant 0 : index
    %c0_11 = arith.constant 0 : index
    %c0_12 = arith.constant 0 : index
    %c0_13 = arith.constant 0 : index
    %9 = vector.load %arg4[%c0_10, %c0_11, %c0_12, %c0_13] : memref<1x3x8x16xf32, #tpu.memory_space<vmem>>, vector<1x1x8x16xf32>
    %10 = vector.shape_cast %9 : vector<1x1x8x16xf32> to vector<8x16xf32>
    %c0_14 = arith.constant 0 : index
    %c1_15 = arith.constant 1 : index
    %c0_16 = arith.constant 0 : index
    %c0_17 = arith.constant 0 : index
    %11 = vector.load %arg4[%c0_14, %c1_15, %c0_16, %c0_17] : memref<1x3x8x16xf32, #tpu.memory_space<vmem>>, vector<1x1x8x16xf32>
    %12 = vector.shape_cast %11 : vector<1x1x8x16xf32> to vector<8x16xf32>
    %c0_18 = arith.constant 0 : index
    %c2_19 = arith.constant 2 : index
    %c0_20 = arith.constant 0 : index
    %c0_21 = arith.constant 0 : index
    %13 = vector.load %arg4[%c0_18, %c2_19, %c0_20, %c0_21] : memref<1x3x8x16xf32, #tpu.memory_space<vmem>>, vector<1x1x8x16xf32>
    %14 = vector.shape_cast %13 : vector<1x1x8x16xf32> to vector<8x16xf32>
    %15 = arith.maximumf %12, %14 : vector<8x16xf32>
    %16 = arith.maximumf %10, %15 : vector<8x16xf32>
    %cst = arith.constant 0.000000e+00 : f32
    %17 = vector.broadcast %cst : f32 to vector<8x16xf32>
    %18 = arith.cmpf one, %16, %17 : vector<8x16xf32>
    %19 = arith.mulf %4, %4 : vector<8x16xf32>
    %20 = arith.mulf %6, %6 : vector<8x16xf32>
    %21 = arith.addf %19, %20 : vector<8x16xf32>
    %22 = arith.mulf %8, %8 : vector<8x16xf32>
    %23 = arith.addf %21, %22 : vector<8x16xf32>
    %24 = arith.mulf %10, %10 : vector<8x16xf32>
    %25 = arith.mulf %12, %12 : vector<8x16xf32>
    %26 = arith.addf %24, %25 : vector<8x16xf32>
    %27 = arith.mulf %14, %14 : vector<8x16xf32>
    %28 = arith.addf %26, %27 : vector<8x16xf32>
    %29 = arith.mulf %4, %10 : vector<8x16xf32>
    %30 = arith.mulf %6, %12 : vector<8x16xf32>
    %31 = arith.addf %29, %30 : vector<8x16xf32>
    %32 = arith.mulf %8, %14 : vector<8x16xf32>
    %33 = arith.addf %31, %32 : vector<8x16xf32>
    %34 = math.sqrt %23 : vector<8x16xf32>
    %35 = math.sqrt %28 : vector<8x16xf32>
    %cst_22 = arith.constant 9.99999996E-13 : f32
    %36 = vector.broadcast %cst_22 : f32 to vector<8x16xf32>
    %37 = arith.addf %34, %36 : vector<8x16xf32>
    %cst_23 = arith.constant 9.99999996E-13 : f32
    %38 = vector.broadcast %cst_23 : f32 to vector<8x16xf32>
    %39 = arith.addf %35, %38 : vector<8x16xf32>
    %40 = arith.mulf %37, %39 : vector<8x16xf32>
    %41 = tpu.reciprocal %40 {approx = true} : vector<8x16xf32> -> vector<8x16xf32>
    %42 = arith.mulf %33, %41 : vector<8x16xf32>
    %43 = arith.mulf %34, %35 : vector<8x16xf32>
    %44 = arith.mulf %43, %41 : vector<8x16xf32>
    %cst_24 = arith.constant 9.99999993E-9 : f32
    %45 = vector.broadcast %cst_24 : f32 to vector<8x16xf32>
    %46 = arith.maximumf %44, %45 : vector<8x16xf32>
    %47 = arith.divf %42, %46 : vector<8x16xf32>
    %cst_25 = arith.constant 1.000000e+00 : f32
    %48 = vector.broadcast %cst_25 : f32 to vector<8x16xf32>
    %49 = arith.subf %48, %47 : vector<8x16xf32>
    %cst_26 = arith.constant 0.000000e+00 : f32
    %50 = vector.broadcast %cst_26 : f32 to vector<8x16xf32>
    %51 = arith.select %18, %49, %50 : vector<8x16xi1>, vector<8x16xf32>
    %52 = arith.extui %18 : vector<8x16xi1> to vector<8x16xi32>
    %53 = arith.sitofp %52 : vector<8x16xi32> to vector<8x16xf32>
    %c0_27 = arith.constant 0 : index
    %c0_28 = arith.constant 0 : index
    %c0_29 = arith.constant 0 : index
    %c0_30 = arith.constant 0 : index
    %54 = vector.load %arg5[%c0_27, %c0_28, %c0_29, %c0_30] : memref<1x1x1x16xf32, #tpu.memory_space<vmem>>, vector<1x1x1x16xf32>
    %55 = vector.shape_cast %54 : vector<1x1x1x16xf32> to vector<1x16xf32>
    %cst_31 = arith.constant dense<0.000000e+00> : vector<16xf32>
    %56 = vector.multi_reduction <add>, %51, %cst_31 [0] : vector<8x16xf32> to vector<16xf32>
    %57 = vector.shape_cast %56 : vector<16xf32> to vector<1x16xf32>
    %58 = arith.addf %55, %57 : vector<1x16xf32>
    %c0_32 = arith.constant 0 : index
    %c0_33 = arith.constant 0 : index
    %c0_34 = arith.constant 0 : index
    %c0_35 = arith.constant 0 : index
    %59 = vector.load %arg5[%c0_32, %c0_33, %c0_34, %c0_35] : memref<1x1x1x16xf32, #tpu.memory_space<vmem>>, vector<1x1x1x16xf32>
    %60 = vector.shape_cast %59 : vector<1x1x1x16xf32> to vector<1x16xf32>
    %61 = vector.shape_cast %58 : vector<1x16xf32> to vector<1x1x1x16xf32>
    tpu.vector_store %arg5[%c0_32, %c0_33, %c0_34, %c0_35], %61 {strides = array<i32>} : memref<1x1x1x16xf32, #tpu.memory_space<vmem>>, vector<1x1x1x16xf32>,
    %c0_36 = arith.constant 0 : index
    %c0_37 = arith.constant 0 : index
    %c0_38 = arith.constant 0 : index
    %c0_39 = arith.constant 0 : index
    %62 = vector.load %arg6[%c0_36, %c0_37, %c0_38, %c0_39] : memref<1x1x1x16xf32, #tpu.memory_space<vmem>>, vector<1x1x1x16xf32>
    %63 = vector.shape_cast %62 : vector<1x1x1x16xf32> to vector<1x16xf32>
    %cst_40 = arith.constant dense<0.000000e+00> : vector<16xf32>
    %64 = vector.multi_reduction <add>, %53, %cst_40 [0] : vector<8x16xf32> to vector<16xf32>
    %65 = vector.shape_cast %64 : vector<16xf32> to vector<1x16xf32>
    %66 = arith.addf %63, %65 : vector<1x16xf32>
    %c0_41 = arith.constant 0 : index
    %c0_42 = arith.constant 0 : index
    %c0_43 = arith.constant 0 : index
    %c0_44 = arith.constant 0 : index
    %67 = vector.load %arg6[%c0_41, %c0_42, %c0_43, %c0_44] : memref<1x1x1x16xf32, #tpu.memory_space<vmem>>, vector<1x1x1x16xf32>
    %68 = vector.shape_cast %67 : vector<1x1x1x16xf32> to vector<1x16xf32>
    %69 = vector.shape_cast %66 : vector<1x16xf32> to vector<1x1x1x16xf32>
    tpu.vector_store %arg6[%c0_41, %c0_42, %c0_43, %c0_44], %69 {strides = array<i32>} : memref<1x1x1x16xf32, #tpu.memory_space<vmem>>, vector<1x1x1x16xf32>,
    return
  }
  func.func @transform_0(%arg0: i32, %arg1: i32, %arg2: i32) -> (i32, i32, i32, i32) {
    %c1_i32 = arith.constant 1 : i32
    %0 = arith.muli %arg1, %c1_i32 : i32
    %1 = arith.addi %0, %arg2 : i32
    %c0_i32 = arith.constant 0 : i32
    %c0_i32_0 = arith.constant 0 : i32
    %c0_i32_1 = arith.constant 0 : i32
    return %arg0, %c0_i32, %1, %c0_i32_0 : i32, i32, i32, i32
  }
  func.func @transform_1(%arg0: i32, %arg1: i32, %arg2: i32) -> (i32, i32, i32, i32) {
    %c1_i32 = arith.constant 1 : i32
    %0 = arith.muli %arg1, %c1_i32 : i32
    %1 = arith.addi %0, %arg2 : i32
    %c0_i32 = arith.constant 0 : i32
    %c0_i32_0 = arith.constant 0 : i32
    %c0_i32_1 = arith.constant 0 : i32
    return %arg0, %c0_i32, %1, %c0_i32_0 : i32, i32, i32, i32
  }
  func.func @transform_2(%arg0: i32, %arg1: i32, %arg2: i32) -> (i32, i32, i32, i32) {
    %c0_i32 = arith.constant 0 : i32
    %c0_i32_0 = arith.constant 0 : i32
    %c0_i32_1 = arith.constant 0 : i32
    return %arg0, %arg1, %c0_i32, %c0_i32_0 : i32, i32, i32, i32
  }
  func.func @transform_3(%arg0: i32, %arg1: i32, %arg2: i32) -> (i32, i32, i32, i32) {
    %c0_i32 = arith.constant 0 : i32
    %c0_i32_0 = arith.constant 0 : i32
    %c0_i32_1 = arith.constant 0 : i32
    return %arg0, %arg1, %c0_i32, %c0_i32_0 : i32, i32, i32, i32
  }
}

</mosaic_0001>

<bundles_post_ra>
// kernel: tpu_custom_call.1
= control target key start
LH: loop header
LB: loop body
LE: loop exit
PB: predicated region body
PF: predicated region fallthrough
CT: control target
= control target key end

     0   :  { %s1235_s0 = inlined_call_operand.hbm [shape: f32[2,3,16,16], index: 0, kind: input, shape index: {}]   ;;  %s1236_s1 = inlined_call_operand.hbm [shape: f32[2,3,16,16], index: 1, kind: input, shape index: {}]   ;;  %s1237_s2 = inlined_call_operand.hbm [shape: f32[2,2,1,16], index: 2, kind: output, shape index: {0}]   ;;  %s1238_s3 = inlined_call_operand.hbm [shape: f32[2,2,1,16], index: 3, kind: output, shape index: {1}]  }
   0x1   :  { %1246 = sst [smem:[#allocation17_spill]] %s1235_s0 }
   0x2   :  { %9 = vsyncpa [#allocation3], 0 }
   0x3   :  { %11 = vsyncpa [#allocation3 + $0x1], 0 }
   0x4   :  { %12 = vsyncpa [#allocation6], 0 }
   0x5   :  { %14 = vsyncpa [#allocation6 + $0x1], 0 }
   0x6   :  { %15 = vsyncpa [#allocation4], 0 }
   0x7   :  { %17 = vsyncpa [#allocation4 + $0x1], 0 }
   0x8   :  { %18 = vsyncpa [#allocation9], 0 }
   0x9   :  { %20 = vsyncpa [#allocation9 + $0x1], 0  ;;  %s882_s12 = smov 0   ;;  %s884_s13 = smov 0  }
   0xa   :  { %s886_s14 = smov 0   ;;  %s888_s15 = smov 0  }
   0xb   :  { %s890_s16 = smov 0   ;;  %s892_s17 = smov 0  }
   0xc   :  { %s894_s18 = smov 0   ;;  %s896_s19 = smov 0  }
   0xd LB: > { %1247 = sst [smem:[#allocation14_spill]] %s848_s18  ;;  %s535_s20 = sadd.s32 4294967295, %s852_s19   ;;  %s852_s19 = sphi %s896_s19, %s26_s19   ;;  %s848_s18 = sphi %s894_s18, %s1264_s18   ;;  %s844_s17 = sphi %s892_s17, %s1269_s17   ;;  %s840_s16 = sphi %s890_s16, %s1262_s16   ;;  %s836_s15 = sphi %s888_s15, %s1268_s15   ;;  %s832_s14 = sphi %s886_s14, %s1267_s14   ;;  %s828_s13 = sphi %s884_s13, %s1266_s13   ;;  %s824_s12 = sphi %s882_s12, %s1265_s12  }
   0xe   : > { %s536_s21 = sadd.s32 4294967294, %s852_s19   ;;  %s41_s22 = sadd.s32 1, %s844_s17 }
   0xf   : > { %s45_s23 = sadd.s32 1, %s848_s18  ;;  %p43_p0 = scmp.ge.s32.totalorder %s41_s22, 2 }
  0x10   : > { %s56_s24 = sadd.s32 1, %s832_s14  ;;  %p63_p1 = scmp.ne.s32.totalorder %s832_s14, %s828_s13 }
  0x11   : > { %p64_p2 = scmp.eq.s32.totalorder %s852_s19, 0  ;;  %s1271_s22 = smov (%p43_p0, %s41_s22), 0 }
  0x12   : > { %1248 = sst [smem:[#allocation15_spill]] %s1271_s22  ;;  %s1273_s23 = smov (!%p43_p0, %s45_s23), %s848_s18 }
  0x13   : > { %s52_s25 = ssub.s32 %s844_s17, %s1271_s22  ;;  %p935_p3 = por %p64_p2, %p63_p1 }
  0x14   : > { %p47_p4 = scmp.ge.s32.totalorder %s1273_s23, 2  ;;  %p69_p5 = scmp.ne.s32.totalorder %s828_s13, %s824_s12 }
  0x15   : > { %p70_p6 = scmp.eq.s32.totalorder %s535_s20, 0  ;;  %p125_p7 = scmp.eq.s32.totalorder %s535_s20, 3 }
  0x16   : > { %s1275_s23 = smov (%p47_p4, %s1273_s23), 0  ;;  %p131_p10 = scmp.eq.s32.totalorder %s536_s21, 3 }
  0x17   : > { %1250 = sst [smem:[#allocation16_spill]] %s1275_s23  ;;  %p943_p8 = por %p70_p6, %p69_p5 }
  0x18   : > { %p947_p9 = por %p125_p7, %p63_p1  ;;  %s51_s29 = ssub.s32 %s848_s18, %s1275_s23 }
  0x19   : > { %s1251_s27 = scalar_select %p943_p8, 1, 0 }
  0x1a   : > { %s1252_s28 = scalar_select %p947_p9, 1, 0 }
  0x1b   : > { %s53_s30 = sor.u32 %s52_s25, %s51_s29  ;;  %p953_p12 = por %p131_p10, %p69_p5 }
  0x1c   : > { %p54_p11 = scmp.eq.s32.totalorder %s53_s30, 0  ;;  %p580_p13 = scmp.lt.s32.totalorder %s852_s19, 4 }
  0x1d   : > { %s1253_s4 = scalar_select %p953_p12, 1, 0 }
  0x1e   : > { %s959_s5 = sand.u32 1, %s832_s14   ;;  %s554_s8 = smul.u32 6, %s848_s18 }
  0x1f   : > { %s962_s6 = scalar_select %p54_p11, %s832_s14, %s56_s24  }
  0x20   : > { %s1239_s7 = smul.u32 24, %s959_s5  ;;  %p968_p0 = pnand %p580_p13, %p935_p3 }
  0x21   : > { %s973_s10 = sadd.s32 %s844_s17, %s554_s8  ;;  %s1255_s0 = sld [smem:[#allocation17_spill]] }
  0x22   : > { %s183_s11 = scalar_lea.vmem [#allocation2], %s1239_s7  ;;  %s1240_s21 = sshll.u32 %s973_s10, 7 }
  0x23   : > { %s192_s20 = sshll.u32 %s183_s11, 4  ;;  %s180_s29 = scalar_lea.sflag [#allocation3], %s959_s5  ;;  %s978_s20 = int_to_ptr.vmem [resolvable:$true] %s192_s20 }
  0x24   : > { %p660_p2 = pneg %p968_p0 }
  0x27   : > { %s985_s26 = scalar_lea.hbm %s1255_s0, %s1240_s21  ;;  %s663_s7 = scalar_lea.hbm %s1255_s0, 1536 }
  0x28   : > { %s658_s30 = scalar_lea.hbm %s985_s26, 384  ;;  %p664_p5 = scmp.lt.u32.totalorder %s985_s26, %s1255_s0 }
  0x29   : > { %p659_p1 = scmp.ne.s32.totalorder %s985_s26, %s658_s30  ;;  %p665_p6 = scmp.lt.u32.totalorder %s663_s7, %s658_s30 }
  0x2a   : > { %p667_p10 = scmp.lt.u32.totalorder %s658_s30, %s985_s26 }
  0x2b   : > { %p661_p3 = pnand %p660_p2, %p659_p1  ;;  %p666_p7 = por %p665_p6, %p664_p5 }
  0x2d   : > { %p662_p4 = pneg %p661_p3  ;;  %p668_p11 = por %p667_p10, %p666_p7 }
  0x2f   : > { %p669_p13 = pnand %p668_p11, %p662_p4 }
  0x31   : > { %672 = shalt.err (!%p669_p13)
}
  0x32   : > { %s673_s21 = scalar_lea.vmem %s978_s20, 384  ;;  %s854_s8 = smov [#allocation2]  }
  0x33   : > { %p674_p1 = scmp.ne.s32.totalorder %s978_s20, %s673_s21  ;;  %s678_s11 = sshll.u32 %s854_s8, 4  ;;  %s679_s11 = int_to_ptr.vmem [resolvable:$false] %s678_s11 }
  0x34   : > { %s680_s24 = scalar_lea.vmem %s679_s11, 768  ;;  %p681_p9 = scmp.lt.s32.totalorder %s978_s20, %s679_s11 }
  0x35   : > { %p676_p3 = pnand %p674_p1, %p660_p2  ;;  %p682_p5 = scmp.lt.s32.totalorder %s680_s24, %s673_s21 }
  0x37   : > { %p677_p12 = pneg %p676_p3  ;;  %p683_p6 = por %p682_p5, %p681_p9 }
  0x39   : > { %p684_p7 = pnand %p683_p6, %p677_p12 }
  0x3b   : > { %687 = shalt.err (!%p684_p7)
}
  0x3c   : > { %s855_s7 = smov 256   ;;  %s856_s30 = smov 128  }
  0x3d   : > { %s857_s25 = smov 8   ;;  %p541_p9 = scmp.ge.s32.totalorder %s852_s19, 1 }
  0x3e   : > { %569 = dma.hbm_to_vmem [thread:$0]  (!%p968_p0), %s985_s26, 384, %s978_s20, %s180_s29, %s855_s7, %s856_s30, %s857_s25  }
  0x3f   : > { %p223_p12 = scmp.lt.s32.totalorder %s852_s19, 5  ;;  %s1257_s8 = sshll.u32 %s973_s10, 7 }
  0x40   : > { %s1029_s0 = scalar_lea.hbm %s1236_s1, %s1257_s8  ;;  %s1258_s23 = smul.u32 24, %s959_s5 }
  0x41   : > { %p1020_p4 = pnand %p541_p9, %p223_p12  ;;  %s203_s20 = scalar_lea.sflag [#allocation6], %s959_s5 }
  0x42   : > { %s206_s22 = scalar_lea.vmem [#allocation5], %s1258_s23  ;;  %s688_s26 = scalar_lea.hbm %s1029_s0, 384 }
  0x43   : > { %s215_s18 = sshll.u32 %s206_s22, 4  ;;  %p689_p10 = scmp.ne.s32.totalorder %s1029_s0, %s688_s26  ;;  %s1033_s18 = int_to_ptr.vmem [resolvable:$true] %s215_s18 }
  0x44   : > { %s693_s8 = scalar_lea.hbm %s1236_s1, 1536  ;;  %p694_p1 = scmp.lt.u32.totalorder %s1029_s0, %s1236_s1 }
  0x45   : > { %p691_p11 = pnand %p689_p10, %p660_p2  ;;  %p695_p3 = scmp.lt.u32.totalorder %s693_s8, %s688_s26 }
  0x46   : > { %p697_p6 = scmp.lt.u32.totalorder %s688_s26, %s1029_s0 }
  0x47   : > { %p692_p13 = pneg %p691_p11  ;;  %p696_p5 = por %p695_p3, %p694_p1 }
  0x49   : > { %p698_p7 = por %p697_p6, %p696_p5 }
  0x4b   : > { %p699_p9 = pnand %p698_p7, %p692_p13 }
  0x4d   : > { %702 = shalt.err (!%p699_p9)
}
  0x4e   : > { %s703_s22 = scalar_lea.vmem %s1033_s18, 384  ;;  %s858_s23 = smov [#allocation5]  }
  0x4f   : > { %p704_p12 = scmp.ne.s32.totalorder %s1033_s18, %s703_s22  ;;  %s708_s10 = sshll.u32 %s858_s23, 4  ;;  %s709_s10 = int_to_ptr.vmem [resolvable:$false] %s708_s10 }
  0x50   : > { %s710_s29 = scalar_lea.vmem %s709_s10, 768  ;;  %p711_p8 = scmp.lt.s32.totalorder %s1033_s18, %s709_s10 }
  0x51   : > { %p706_p10 = pnand %p704_p12, %p660_p2  ;;  %p712_p1 = scmp.lt.s32.totalorder %s710_s29, %s703_s22 }
  0x53   : > { %p707_p11 = pneg %p706_p10  ;;  %p713_p3 = por %p712_p1, %p711_p8 }
  0x55   : > { %p714_p5 = pnand %p713_p3, %p707_p11 }
  0x57   : > { %717 = shalt.err (!%p714_p5)
}
  0x58   : > { %572 = dma.hbm_to_vmem [thread:$0]  (!%p968_p0), %s1029_s0, 384, %s1033_s18, %s203_s20, %s855_s7, %s856_s30, %s857_s25  }
  0x59   : > { %227 = sbr.rel (%p1020_p4) target bundleno = 198 (0xc6), region = 28  ;;  %s1067_s26 = sand.u32 (!%p1020_p4), 1, %s828_s13  }
  0x5a   : > { %s557_s8 = smul.u32 (!%p1020_p4), 24, %s1067_s26  ;;  %s230_s11 = scalar_lea.sflag (!%p1020_p4), [#allocation3], %s1067_s26 }
  0x5b   : > { %p1259_p8 = scmp.ne.s32.totalorder (!%p1020_p4), %s1251_s27, 0 }
  0x5c   : > { %s233_s9 = scalar_lea.vmem (!%p1020_p4), [#allocation2], %s557_s8 }
  0x60   : > { %807 = dma.done.wait (%p1259_p8), %s230_s11, 384  }
  0x61   : > { %809 = vsyncadd (%p1259_p8), %s230_s11, 4294966912  ;;  %s239_s0 = scalar_lea.sflag [#allocation6], %s1067_s26  ;;  %s242_s18 = scalar_lea.vmem [#allocation5], %s557_s8 }
  0x62   : > { %811 = dma.done.wait (%p1259_p8), %s239_s0, 384  }
  0x63   : > { %813 = vsyncadd (%p1259_p8), %s239_s0, 4294966912  ;;  %vm279_vm0 = vcmask 122880   ;;  %s1081_s5 = scalar_lea.vmem [#allocation7], %s1067_s26  ;;  %v859_v0 = vmov 0.0   ;;  %s1086_s7 = scalar_lea.vmem [#allocation8], %s1067_s26  ;;  %v1090_v1 = vld [vmem:[%s233_s9] sm:$0xff] }
  0x64   : > { %280 = vst.msk [vmem:[%s1081_s5] sm:$0x1] %vm279_vm0, %v859_v0  ;;  %281 = vst.msk [vmem:[%s1086_s7] sm:$0x1] %vm279_vm0, %v859_v0  ;;  %v1092_v2 = vld [vmem:[%s233_s9 + $0x8] sm:$0xff]  ;;  %v1094_v3 = vld [vmem:[%s233_s9 + $0x10] sm:$0xff]  ;;  %v295_v7 = vmul.f32 %v1090_v1, %v1090_v1 }
  0x65   : > { %v1096_v4 = vld [vmem:[%s242_s18] sm:$0xff]  ;;  %v1098_v5 = vld [vmem:[%s242_s18 + $0x8] sm:$0xff]  ;;  %v1100_v6 = vld [vmem:[%s242_s18 + $0x10] sm:$0xff]  ;;  %v296_v8 = vmul.f32 %v1092_v2, %v1092_v2  ;;  %v298_v9 = vmul.f32 %v1094_v3, %v1094_v3  ;;  %vm339_vm2 = vcmask 130048   ;;  %s547_s27 = sshll.u32 %s840_s16, 1  ;;  %s394_s25 = sshll.u32 %s1086_s7, 4  ;;  %s1137_s25 = int_to_ptr.vmem [resolvable:$true] %s394_s25 }
  0x66   : > { %v292_v10 = vmax.f32 %v1098_v5, %v1100_v6  ;;  %v300_v11 = vmul.f32 %v1096_v4, %v1096_v4  ;;  %v301_v12 = vmul.f32 %v1098_v5, %v1098_v5  ;;  %v303_v13 = vmul.f32 %v1100_v6, %v1100_v6  ;;  %s1125_s30 = sadd.s32 %s836_s15, %s547_s27  ;;  %s365_s24 = scalar_lea.sflag [#allocation9], %s1067_s26 }
  0x67   : > { %v297_v14 = vadd.f32 %v296_v8, %v295_v7  ;;  %s548_s16 = sshll.u32 %s1125_s30, 4  ;;  %s718_s22 = scalar_lea.vmem %s1137_s25, 16 }
  0x68   : > { %v1117_v15 = vmax.f32 %v1096_v4, %v292_v10  ;;  %v302_v16 = vadd.f32 %v301_v12, %v300_v11  ;;  %s1135_s20 = scalar_lea.hbm %s1238_s3, %s548_s16  ;;  %p719_p0 = scmp.ne.s32.totalorder %s1137_s25, %s718_s22 }
  0x69   : > { %v299_v17 = vadd.f32 %v298_v9, %v297_v14  ;;  %p1260_p2 = scmp.ne.s32.totalorder %s1252_s28, 0  ;;  %s860_s23 = smov [#allocation8]  }
  0x6a   : > { %vm294_vm1 = vcmp.ne.f32.partialorder %v1117_v15, 0.0  ;;  %v304_v18 = vadd.f32 %v303_v13, %v302_v16  ;;  %s722_s10 = sshll.u32 %s860_s23, 4  ;;  %s723_s10 = int_to_ptr.vmem [resolvable:$false] %s722_s10 }
  0x6b   : > { %650 = vrsqrt.f32 %v299_v17  ;;  %v546_v19 = vsel %vm294_vm1, 1.0, %v859_v0  ;;  %vm312_vm3 = vcmp.eq.f32.partialorder %v299_v17, inf  ;;  %v315_v25 = vand.u32 2147483648, %v299_v17  ;;  %v350_v33 = vld [vmem:[%s1086_s7] sm:$0x1]  ;;  %p720_p4 = pnand %p719_p0, %p1260_p2  ;;  %s724_s29 = scalar_lea.vmem %s723_s10, 32 }
  0x6c   : > { %652 = vrsqrt.f32 %v304_v18  ;;  %v351_v20 = vsel %vm339_vm2, %v546_v19, 0.0  ;;  %vm314_vm4 = vcmp.eq.f32.partialorder %v299_v17, 0.0  ;;  %vm319_vm5 = vcmp.eq.f32.partialorder %v304_v18, inf  ;;  %p725_p6 = scmp.lt.s32.totalorder %s1137_s25, %s723_s10  ;;  %p726_p7 = scmp.lt.s32.totalorder %s724_s29, %s718_s22 }
  0x6d   : > { %v352_v21 = vrot.slane %v351_v20, 4  ;;  %v322_v29 = vand.u32 2147483648, %v304_v18  ;;  %vm321_vm6 = vcmp.eq.f32.partialorder %v304_v18, 0.0  ;;  %p721_p13 = pneg %p720_p4 }
  0x6e   : > { %p727_p9 = por %p726_p7, %p725_p6 }
  0x6f   : > { %v353_v22 = vadd.f32 %v352_v21, %v351_v20 }
  0x70   : > { %p728_p12 = pnand %p727_p9, %p721_p13 }
  0x71   : > { %v354_v23 = vrot.slane %v353_v22, 2 }
  0x73   : > { %v355_v26 = vadd.f32 %v354_v23, %v353_v22 }
  0x75   : > { %v651_v24 = vpop.eup %650  ;;  %v356_v31 = vrot.slane %v355_v26, 1 }
  0x76   : > { %v653_v27 = vpop.eup %652  ;;  %v311_v28 = vmul.f32 %v651_v24, %v299_v17 }
  0x77   : > { %v318_v30 = vmul.f32 %v653_v27, %v304_v18  ;;  %v357_v36 = vadd.f32 %v356_v31, %v355_v26 }
  0x78   : > { %v313_v32 = vsel %vm312_vm3, %v299_v17, %v311_v28 }
  0x79   : > { %v316_v34 = vsel %vm314_vm4, %v315_v25, %v313_v32  ;;  %v320_v35 = vsel %vm319_vm5, %v304_v18, %v318_v30  ;;  %v358_v40 = vadd.f32 %v357_v36, %v350_v33 }
  0x7a   : > { %v323_v37 = vsel %vm321_vm6, %v322_v29, %v320_v35  ;;  %v324_v38 = vadd.f32 1e-12, %v316_v34 }
  0x7b   : > { %v325_v39 = vadd.f32 1e-12, %v323_v37  ;;  %359 = vst.msk [vmem:[%s1086_s7] sm:$0x1] %vm279_vm0, %v358_v40 }
  0x7d   : > { %v326_v41 = vmul.f32 %v325_v39, %v324_v38 }
  0x7e   : > { %731 = shalt.err (!%p728_p12)
}
  0x7f   : > { %s732_s8 = scalar_lea.hbm %s1135_s20, 16  ;;  %s736_s0 = scalar_lea.hbm %s1238_s3, 64 }
  0x80   : > { %p733_p10 = scmp.ne.s32.totalorder %s1135_s20, %s732_s8  ;;  %p737_p3 = scmp.lt.u32.totalorder %s1135_s20, %s1238_s3 }
  0x81   : > { %p738_p5 = scmp.lt.u32.totalorder %s736_s0, %s732_s8  ;;  %p740_p0 = scmp.lt.u32.totalorder %s732_s8, %s1135_s20 }
  0x82   : > { %p734_p11 = pnand %p733_p10, %p1260_p2 }
  0x83   : > { %p739_p8 = por %p738_p5, %p737_p3 }
  0x84   : > { %p735_p1 = pneg %p734_p11 }
  0x85   : > { %p741_p4 = por %p740_p0, %p739_p8 }
  0x87   : > { %p742_p13 = pnand %p741_p4, %p735_p1 }
  0x89   : > { %745 = shalt.err (!%p742_p13)
}
  0x8a   : > { %563 = dma.vmem_to_hbm [thread:$0]  (%p1260_p2), %s1137_s25, 16, %s1135_s20, %s365_s24   ;;  %654 = vrcp.f32 %v326_v41  ;;  %v329_v42 = vmul.f32 %v323_v37, %v316_v34  ;;  %v305_v44 = vmul.f32 %v1096_v4, %v1090_v1  ;;  %v306_v45 = vmul.f32 %v1098_v5, %v1092_v2  ;;  %v338_v62 = vld [vmem:[%s1081_s5] sm:$0x1] }
  0x8b   : > { %v308_v49 = vmul.f32 %v1100_v6, %v1094_v3  ;;  %s379_s27 = sshll.u32 %s1081_s5, 4  ;;  %s1179_s21 = scalar_lea.hbm %s1237_s2, %s548_s16  ;;  %s1181_s27 = int_to_ptr.vmem [resolvable:$true] %s379_s27 }
  0x8c   : > { %v307_v48 = vadd.f32 %v306_v45, %v305_v44  ;;  %s361_s20 = scalar_lea.sflag [#allocation4], %s1067_s26  ;;  %s746_s24 = scalar_lea.vmem %s1181_s27, 16 }
  0x8d   : > { %p747_p6 = scmp.ne.s32.totalorder %s1181_s27, %s746_s24  ;;  %s861_s22 = smov [#allocation7]  }
  0x8e   : > { %v309_v50 = vadd.f32 %v308_v49, %v307_v48  ;;  %s750_s30 = sshll.u32 %s861_s22, 4  ;;  %s751_s30 = int_to_ptr.vmem [resolvable:$false] %s750_s30 }
  0x8f   : > { %p748_p7 = pnand %p747_p6, %p1260_p2  ;;  %s752_s23 = scalar_lea.vmem %s751_s30, 32 }
  0x90   : > { %p753_p12 = scmp.lt.s32.totalorder %s1181_s27, %s751_s30  ;;  %p754_p10 = scmp.lt.s32.totalorder %s752_s23, %s746_s24 }
  0x91   : > { %p749_p9 = pneg %p748_p7 }
  0x92   : > { %p755_p11 = por %p754_p10, %p753_p12 }
  0x94   : > { %v655_v43 = vpop.eup %654  ;;  %p756_p1 = pnand %p755_p11, %p749_p9 }
  0x95   : > { %v330_v46 = vmul.f32 %v655_v43, %v329_v42  ;;  %v328_v51 = vmul.f32 %v655_v43, %v309_v50 }
  0x97   : > { %v331_v47 = vmax.f32 %v330_v46, 1e-08 }
  0x99   : > { %656 = vrcp.f32 %v331_v47 }
  0xa3   : > { %v657_v52 = vpop.eup %656 }
  0xa4   : > { %v333_v53 = vmul.f32 %v657_v52, %v328_v51 }
  0xa6   : > { %v334_v54 = vsub.f32 1.0, %v333_v53 }
  0xa8   : > { %v335_v55 = vsel %vm294_vm1, %v334_v54, 0.0 }
  0xa9   : > { %v340_v56 = vsel %vm339_vm2, %v335_v55, 0.0 }
  0xaa   : > { %v341_v57 = vrot.slane %v340_v56, 4 }
  0xac   : > { %v342_v58 = vadd.f32 %v341_v57, %v340_v56 }
  0xae   : > { %v343_v59 = vrot.slane %v342_v58, 2 }
  0xb0   : > { %v344_v60 = vadd.f32 %v343_v59, %v342_v58 }
  0xb2   : > { %v345_v61 = vrot.slane %v344_v60, 1 }
  0xb4   : > { %v346_v63 = vadd.f32 %v345_v61, %v344_v60 }
  0xb6   : > { %v347_v0 = vadd.f32 %v346_v63, %v338_v62 }
  0xb8   : > { %349 = vst.msk [vmem:[%s1081_s5] sm:$0x1] %vm279_vm0, %v347_v0 }
  0xb9   : > { %759 = shalt.err (!%p756_p1)
}
  0xba   : > { %s760_s26 = scalar_lea.hbm %s1179_s21, 16  ;;  %s764_s10 = scalar_lea.hbm %s1237_s2, 64 }
  0xbb   : > { %p761_p3 = scmp.ne.s32.totalorder %s1179_s21, %s760_s26  ;;  %p765_p0 = scmp.lt.u32.totalorder %s1179_s21, %s1237_s2 }
  0xbc   : > { %p766_p4 = scmp.lt.u32.totalorder %s764_s10, %s760_s26  ;;  %p768_p6 = scmp.lt.u32.totalorder %s760_s26, %s1179_s21 }
  0xbd   : > { %p762_p5 = pnand %p761_p3, %p1260_p2 }
  0xbe   : > { %p767_p13 = por %p766_p4, %p765_p0 }
  0xbf   : > { %p763_p8 = pneg %p762_p5 }
  0xc0   : > { %p769_p7 = por %p768_p6, %p767_p13 }
  0xc2   : > { %p770_p9 = pnand %p769_p7, %p763_p8 }
  0xc4   : > { %773 = shalt.err (!%p770_p9)
}
  0xc5   : > { %562 = dma.vmem_to_hbm [thread:$0]  (%p1260_p2), %s1181_s27, 16, %s1179_s21, %s361_s20  }
  0xc6 PF: > { %p581_p12 = scmp.ge.s32.totalorder %s852_s19, 2  ;;  %s406_s11 = sand.u32 1, %s824_s12  }
  0xc7   : > { %p1261_p10 = scmp.ne.s32.totalorder %s1253_s4, 0  ;;  %s407_s9 = scalar_lea.sflag [#allocation4], %s406_s11 }
  0xc9   : > { %p574_p11 = pnand %p581_p12, %p1261_p10 }
  0xcb   : > { %815 = dma.done.wait (!%p574_p11), %s407_s9, 16  }
  0xcc   : > { %817 = vsyncadd (!%p574_p11), %s407_s9, 4294967280  ;;  %s415_s0 = scalar_lea.sflag [#allocation9], %s406_s11 }
  0xcd   : > { %819 = dma.done.wait (!%p574_p11), %s415_s0, 16  }
  0xce   : > { %821 = vsyncadd (!%p574_p11), %s415_s0, 4294967280  ;;  %s26_s19 = sadd.s32 1, %s852_s19   ;;  %s1262_s16 = sld [smem:[#allocation14_spill]] }
  0xcf   : > { %p23_p1 = scmp.ge.s32.totalorder %s26_s19, 6   ;;  %s1263_s28 = sld [smem:[#allocation15_spill]] }
  0xd0   : > { %s1264_s18 = sld [smem:[#allocation16_spill]]  ;;  %s1265_s12 = smov %s828_s13 }
  0xd1   : > { %s1266_s13 = smov %s832_s14  ;;  %s1267_s14 = smov %s962_s6 }
  0xd2   : > { %s1268_s15 = smov %s844_s17  ;;  %25 = sbr.rel (!%p23_p1) target bundleno = 13 (0xd), region = 111 }
  0xd5   : > { %s1269_s17 = smov %s1263_s28 }
  0xd9   :  { %419 = vsyncpa [#allocation3], 1 }
  0xda   :  { %421 = vsyncpa [#allocation3 + $0x1], 1 }
  0xdb   :  { %422 = vsyncpa [#allocation6], 1 }
  0xdc   :  { %424 = vsyncpa [#allocation6 + $0x1], 1 }
  0xdd   :  { %425 = vsyncpa [#allocation4], 1 }
  0xde   :  { %427 = vsyncpa [#allocation4 + $0x1], 1 }
  0xdf   :  { %428 = vsyncpa [#allocation9], 1 }
  0xe0   :  { %430 = vsyncpa [#allocation9 + $0x1], 1 }

</bundles_post_ra>
